<compile_context>
chip_gen: v6e
topology: v6e:2x2x1
jax: 0.10.0
libtpu: 0.0.40
codegen_flags: <defaults>
</compile_context>

<pallas_src>
import functools

import jax
import jax.numpy as jnp
from jax.experimental import pallas as pl
from jax.experimental.pallas import tpu as pltpu

C_IN = 3
C_OUT = 1024
K_AUG = C_IN + 1  # folded-bias column appended to the weight / ones-row to x


def _basic_kernel(x_ref, w_ref, o_ref):
    # x_ref: (4, tn) bias-augmented NCW point tile (row 3 == ones)
    # w_ref: (1024, 4) folded [W | b]^T
    # o_ref: (1024, tn) NCW output tile
    o_ref[...] = jnp.dot(
        w_ref[...], x_ref[...], preferred_element_type=jnp.float32
    ).astype(o_ref.dtype)


def fold_params(params):
    """Collapse conv1->conv2->conv3 (no activations) into one affine map with
    the bias folded in as a 4th input channel.  Returns W_aug^T: (1024, 4)."""
    w1, b1, w2, b2, w3, b3 = params
    w = w1 @ w2 @ w3                          # (3, 1024)
    b = (b1 @ w2 + b2) @ w3 + b3              # (1, 1024)
    w_aug = jnp.concatenate([w, b], axis=0)   # (4, 1024)
    return jnp.transpose(w_aug)               # (1024, 4)


def _pick_tile(n, tn):
    """Lane-dense spatial tile; never pad the array (ragged last block is OK)."""
    tn = int(tn)
    if tn >= n:
        if n < 128 or n % 128 == 0:
            return n                          # single full-width tile
        return (n // 128) * 128               # lane-dense tiles + ragged tail
    return max(128, (tn // 128) * 128)


@functools.partial(jax.jit, static_argnames=("tn", "out_dtype"))
def basic_forward(x_ncw, params, *, tn=1024, out_dtype=jnp.float32):
    """x_ncw: (B, 3, N) float32 (PyTorch NCW input). Returns (B, 1024, N)."""
    B, c_in, N = x_ncw.shape
    assert c_in == C_IN

    w_fold = fold_params(params)                                  # (1024, 4)
    ones = jnp.ones((B, 1, N), x_ncw.dtype)
    x_aug = jnp.concatenate([x_ncw, ones], axis=1)                # (B, 4, N)

    tile = _pick_tile(N, tn)
    grid = (B, pl.cdiv(N, tile))

    # Only raise the scoped-VMEM limit when pushing past the v5e 16 MiB default.
    vmem_limit = None
    if tile > 1024:
        est = 2 * C_OUT * tile * 4            # output double buffers
        est += 2 * 8 * tile * 4               # input double buffers (sublane-padded)
        est += 2 * C_OUT * 128 * 4            # lane-padded folded-weight buffers
        vmem_limit = est + (4 << 20)

    cost = pl.CostEstimate(
        flops=2 * B * N * C_OUT * K_AUG,
        transcendentals=0,
        bytes_accessed=4 * B * N * (C_OUT + K_AUG) + 4 * C_OUT * K_AUG,
    )

    out = pl.pallas_call(
        _basic_kernel,
        out_shape=jax.ShapeDtypeStruct((B, C_OUT, N), out_dtype),
        grid_spec=pltpu.PrefetchScalarGridSpec(
            num_scalar_prefetch=0,
            grid=grid,
            in_specs=[
                pl.BlockSpec((None, K_AUG, tile), lambda b, j: (b, 0, j)),  # x tile
                pl.BlockSpec((C_OUT, K_AUG), lambda b, j: (0, 0)),          # [W|b]^T
            ],
            out_specs=pl.BlockSpec((None, C_OUT, tile), lambda b, j: (b, 0, j)),
        ),
        compiler_params=pltpu.CompilerParams(
            dimension_semantics=("parallel", "parallel"),
            vmem_limit_bytes=vmem_limit,
        ),
        cost_estimate=cost,
    )(x_aug, w_fold)
    return out


def init_params(key):
    """Deterministic synthetic weights; shapes match nn.Conv1d(in, out, 1)."""
    ks = jax.random.split(key, 6)
    # Stored as (C_in, C_out) so layer k computes x @ Wk; equals PyTorch's
    # weight[out, in, 1] transposed.
    w1 = jax.random.normal(ks[0], (3, 64), jnp.float32) * 0.1
    b1 = jax.random.normal(ks[1], (1, 64), jnp.float32) * 0.1
    w2 = jax.random.normal(ks[2], (64, 128), jnp.float32) * 0.1
    b2 = jax.random.normal(ks[3], (1, 128), jnp.float32) * 0.1
    w3 = jax.random.normal(ks[4], (128, 1024), jnp.float32) * 0.1
    b3 = jax.random.normal(ks[5], (1, 1024), jnp.float32) * 0.1
    return (w1, b1, w2, b2, w3, b3)


def reference_forward(x_ncw, params):
    """Plain-JAX reference of the PyTorch forward (unfolded layer chain)."""
    w1, b1, w2, b2, w3, b3 = params
    x = jnp.transpose(x_ncw, (0, 2, 1))          # (B, N, 3)
    h = x @ w1 + b1
    h = h @ w2 + b2
    h = h @ w3 + b3
    return jnp.transpose(h, (0, 2, 1))           # (B, 1024, N)


if __name__ == "__main__":
    key = jax.random.PRNGKey(0)
    k_x, k_x2, k_p = jax.random.split(key, 3)
    params = init_params(k_p)

    # Small point cloud: single full-width tile (N < lane width).
    B, N = 2, 16
    x = jax.random.normal(k_x, (B, C_IN, N), jnp.float32)
    out = jax.block_until_ready(basic_forward(x, params))
    ref = reference_forward(x, params)
    assert out.shape == (B, C_OUT, N), out.shape
    assert jnp.allclose(out, ref, atol=1e-4, rtol=1e-4), float(jnp.max(jnp.abs(out - ref)))

    # Ragged multi-tile path (N % tile != 0): exercises the no-pad/no-slice epilogue.
    N2 = 300
    x2 = jax.random.normal(k_x2, (B, C_IN, N2), jnp.float32)
    out2 = jax.block_until_ready(basic_forward(x2, params))
    ref2 = reference_forward(x2, params)
    assert out2.shape == (B, C_OUT, N2), out2.shape
    assert jnp.allclose(out2, ref2, atol=1e-4, rtol=1e-4), float(jnp.max(jnp.abs(out2 - ref2)))

    print("KERNEL_OK")
</pallas_src>

<mosaic_0001>
module attributes {stable_mosaic.version = 11 : i64} {
  func.func @_basic_kernel(%arg0: i32, %arg1: i32, %arg2: memref<1x4x16xf32, #tpu.memory_space<vmem>>, %arg3: memref<1024x4xf32, #tpu.memory_space<vmem>>, %arg4: memref<1x1024x16xf32, #tpu.memory_space<vmem>>) attributes {dimension_semantics = [#tpu.dimension_semantics<parallel>, #tpu.dimension_semantics<parallel>], iteration_bounds = array<i64: 2, 1>, scalar_prefetch = 0 : i64, scratch_operands = 0 : i64, tpu.core_type = #tpu.core_type<tc>, window_params = [{transform_indices = @transform_0, window_bounds = array<i64: 1, 4, 16>}, {pipeline_mode = #tpu.pipeline_mode<synchronous>, transform_indices = @transform_1, window_bounds = array<i64: 1024, 4>}, {transform_indices = @transform_2, window_bounds = array<i64: 1, 1024, 16>}]} {
    %c0 = arith.constant 0 : index
    %c0_0 = arith.constant 0 : index
    %0 = vector.load %arg3[%c0, %c0_0] : memref<1024x4xf32, #tpu.memory_space<vmem>>, vector<1024x4xf32>
    %c0_1 = arith.constant 0 : index
    %c0_2 = arith.constant 0 : index
    %c0_3 = arith.constant 0 : index
    %1 = vector.load %arg2[%c0_1, %c0_2, %c0_3] : memref<1x4x16xf32, #tpu.memory_space<vmem>>, vector<1x4x16xf32>
    %2 = vector.shape_cast %1 : vector<1x4x16xf32> to vector<4x16xf32>
    %cst = arith.constant dense<0.000000e+00> : vector<1024x16xf32>
    %3 = tpu.matmul %0, %2, %cst {dimension_numbers = #tpu.dot_dimension_numbers<[1], [0], [0], [1], [0, 0, 1, 1], [], []>} : vector<1024x4xf32>, vector<4x16xf32>, vector<1024x16xf32> -> vector<1024x16xf32>
    %c0_4 = arith.constant 0 : index
    %c0_5 = arith.constant 0 : index
    %c0_6 = arith.constant 0 : index
    %4 = vector.load %arg4[%c0_4, %c0_5, %c0_6] : memref<1x1024x16xf32, #tpu.memory_space<vmem>>, vector<1x1024x16xf32>
    %5 = vector.shape_cast %4 : vector<1x1024x16xf32> to vector<1024x16xf32>
    %6 = vector.shape_cast %3 : vector<1024x16xf32> to vector<1x1024x16xf32>
    tpu.vector_store %arg4[%c0_4, %c0_5, %c0_6], %6 {strides = array<i32>} : memref<1x1024x16xf32, #tpu.memory_space<vmem>>, vector<1x1024x16xf32>,
    return
  }
  func.func @transform_0(%arg0: i32, %arg1: i32) -> (i32, i32, i32) {
    %c0_i32 = arith.constant 0 : i32
    %c0_i32_0 = arith.constant 0 : i32
    return %arg0, %c0_i32, %arg1 : i32, i32, i32
  }
  func.func @transform_1(%arg0: i32, %arg1: i32) -> (i32, i32) {
    %c0_i32 = arith.constant 0 : i32
    %c0_i32_0 = arith.constant 0 : i32
    %c0_i32_1 = arith.constant 0 : i32
    return %c0_i32, %c0_i32_0 : i32, i32
  }
  func.func @transform_2(%arg0: i32, %arg1: i32) -> (i32, i32, i32) {
    %c0_i32 = arith.constant 0 : i32
    %c0_i32_0 = arith.constant 0 : i32
    return %arg0, %c0_i32, %arg1 : i32, i32, i32
  }
}

</mosaic_0001>

<bundles_post_ra>
// kernel: basic_forward.1
= control target key start
LH: loop header
LB: loop body
LE: loop exit
PB: predicated region body
PF: predicated region fallthrough
CT: control target
= control target key end

     0   :  { %s2132_s9 = smov 0   ;;  %s2134_s10 = smov 0   ;;  %s2939_s0 = inlined_call_operand.vmem [shape: f32[2,4,16], index: 0, kind: input, shape index: {}]   ;;  %s2940_s1 = inlined_call_operand.vmem [shape: f32[1024,4], index: 1, kind: input, shape index: {}]   ;;  %s2941_s2 = inlined_call_operand.vmem [shape: f32[2,1024,16], index: 2, kind: output, shape index: {}]  }
   0x1   :  { %s2136_s11 = smov 0  }
   0x2 LB: > { %s24_s12 = sadd.s32 1, %s2111_s10  ;;  %p1608_p0 = scmp.ge.s32.totalorder %s2115_s11, 1  ;;  %s2115_s11 = sphi %s2136_s11, %s12_s11   ;;  %s2111_s10 = sphi %s2134_s10, %s2943_s10   ;;  %s2107_s9 = sphi %s2132_s9, %s2942_s9  }
   0x3   : > { %p26_p1 = scmp.ge.s32.totalorder %s24_s12, 2  ;;  %p130_p2 = scmp.lt.s32.totalorder %s2115_s11, 3 }
   0x5   : > { %s2945_s12 = smov (%p26_p1, %s24_s12), 0  ;;  %p131_p3 = pnand %p1608_p0, %p130_p2 }
   0x6   : > { %p157_p4 = scmp.lt.s32.totalorder (!%p131_p3), %s2107_s9, 1 }
   0x7   : > { %134 = sbr.rel (%p131_p3) target bundleno = 338 (0x152), region = 28 }
   0xc   : > { %v172_v0 = vld [vmem:[%s2940_s1] sm:$0xff]  ;;  %vm301_vm0 = vcmask 31744   ;;  %s2947_s9 = smov (!%p157_p4, %s2107_s9), 1  ;;  %vm686_vm1 = vcmask 1043456   ;;  %v173_v3 = vld [vmem:[%s2940_s1 + $0x8] sm:$0xff]  ;;  %v174_v5 = vld [vmem:[%s2940_s1 + $0x10] sm:$0xff] }
   0xd   : > { %v236_v1 = vld [vmem:[%s2940_s1 + $0x200] sm:$0xff]  ;;  %1875 = vmatprep.mubr.msk.f32.mxu0 %vm301_vm0, %v172_v0  ;;  %s1609_s17 = sshll.u32 %s2947_s9, 2  ;;  %v237_v4 = vld [vmem:[%s2940_s1 + $0x208] sm:$0xff]  ;;  %v238_v6 = vld [vmem:[%s2940_s1 + $0x210] sm:$0xff]  ;;  %s1743_s5 = sshll.u32 %s2947_s9, 10  ;;  %vm1395_vm2 = vcmask 130048  }
   0xe   : > { %1971 = vmatprep.mubr.msk.f32.mxu1 %vm301_vm0, %v236_v1  ;;  %s163_s20 = scalar_lea.vmem %s2939_s0, %s1609_s17  ;;  %v175_v7 = vld [vmem:[%s2940_s1 + $0x18] sm:$0xff]  ;;  %v176_v9 = vld [vmem:[%s2940_s1 + $0x20] sm:$0xff]  ;;  %v177_v11 = vld [vmem:[%s2940_s1 + $0x28] sm:$0xff]  ;;  %s2672_s8 = scalar_lea.vmem %s2941_s2, %s1743_s5 }
   0xf   : > { %v300_v2 = vld [vmem:[%s163_s20] sm:$0xf]  ;;  %v239_v8 = vld [vmem:[%s2940_s1 + $0x218] sm:$0xff]  ;;  %v241_v12 = vld [vmem:[%s2940_s1 + $0x228] sm:$0xff] }
  0x10   : > { %1873 = vmatprep.subr.msk.mxu0 %vm686_vm1, %v300_v2  ;;  %2067 = vmatprep.subr.msk.mxu1 %vm686_vm1, %v300_v2  ;;  %v240_v10 = vld [vmem:[%s2940_s1 + $0x220] sm:$0xff]  ;;  %v178_v13 = vld [vmem:[%s2940_s1 + $0x30] sm:$0xff]  ;;  %v179_v15 = vld [vmem:[%s2940_s1 + $0x38] sm:$0xff] }
  0x11   : > { %1874 = vmatpush3.msk.msra.mxu0 %vm686_vm1, %v300_v2  ;;  %2068 = vmatpush3.msk.msra.mxu1 %vm686_vm1, %v300_v2  ;;  %v242_v14 = vld [vmem:[%s2940_s1 + $0x230] sm:$0xff]  ;;  %v243_v16 = vld [vmem:[%s2940_s1 + $0x238] sm:$0xff]  ;;  %v180_v17 = vld [vmem:[%s2940_s1 + $0x40] sm:$0xff] }
  0x12   : > { %1876 = vmatmul.mubr.msk.f32.vlgmr.msra.gmra.mxu0 %vm301_vm0, %v173_v3  ;;  %1972 = vmatmul.mubr.msk.f32.vlgmr.msra.gmra.mxu1 %vm301_vm0, %v237_v4  ;;  %v244_v18 = vld [vmem:[%s2940_s1 + $0x240] sm:$0xff]  ;;  %v181_v19 = vld [vmem:[%s2940_s1 + $0x48] sm:$0xff]  ;;  %v182_v21 = vld [vmem:[%s2940_s1 + $0x50] sm:$0xff] }
  0x13   : > { %1878 = vmatprep.mubr.msk.f32.mxu0 %vm301_vm0, %v174_v5  ;;  %1974 = vmatprep.mubr.msk.f32.mxu1 %vm301_vm0, %v238_v6  ;;  %v245_v20 = vld [vmem:[%s2940_s1 + $0x248] sm:$0xff]  ;;  %v246_v22 = vld [vmem:[%s2940_s1 + $0x250] sm:$0xff]  ;;  %v183_v23 = vld [vmem:[%s2940_s1 + $0x58] sm:$0xff] }
  0x14   : > { %v247_v24 = vld [vmem:[%s2940_s1 + $0x258] sm:$0xff]  ;;  %v184_v25 = vld [vmem:[%s2940_s1 + $0x60] sm:$0xff]  ;;  %v185_v27 = vld [vmem:[%s2940_s1 + $0x68] sm:$0xff] }
  0x15   : > { %v248_v26 = vld [vmem:[%s2940_s1 + $0x260] sm:$0xff]  ;;  %v249_v28 = vld [vmem:[%s2940_s1 + $0x268] sm:$0xff]  ;;  %v186_v29 = vld [vmem:[%s2940_s1 + $0x70] sm:$0xff] }
  0x16   : > { %1879 = vmatmul.mubr.msk.f32.gmra.mxu0 %vm301_vm0, %v175_v7  ;;  %1975 = vmatmul.mubr.msk.f32.gmra.mxu1 %vm301_vm0, %v239_v8  ;;  %v250_v30 = vld [vmem:[%s2940_s1 + $0x270] sm:$0xff]  ;;  %v187_v31 = vld [vmem:[%s2940_s1 + $0x78] sm:$0xff]  ;;  %v188_v33 = vld [vmem:[%s2940_s1 + $0x80] sm:$0xff] }
  0x17   : > { %1881 = vmatprep.mubr.msk.f32.mxu0 %vm301_vm0, %v176_v9  ;;  %1977 = vmatprep.mubr.msk.f32.mxu1 %vm301_vm0, %v240_v10  ;;  %v251_v32 = vld [vmem:[%s2940_s1 + $0x278] sm:$0xff]  ;;  %v252_v34 = vld [vmem:[%s2940_s1 + $0x280] sm:$0xff]  ;;  %v189_v35 = vld [vmem:[%s2940_s1 + $0x88] sm:$0xff] }
  0x18   : > { %v253_v36 = vld [vmem:[%s2940_s1 + $0x288] sm:$0xff]  ;;  %v190_v37 = vld [vmem:[%s2940_s1 + $0x90] sm:$0xff]  ;;  %v191_v39 = vld [vmem:[%s2940_s1 + $0x98] sm:$0xff] }
  0x19   : > { %v254_v38 = vld [vmem:[%s2940_s1 + $0x290] sm:$0xff]  ;;  %v255_v40 = vld [vmem:[%s2940_s1 + $0x298] sm:$0xff]  ;;  %v192_v41 = vld [vmem:[%s2940_s1 + $0xa0] sm:$0xff] }
  0x1a   : > { %1882 = vmatmul.mubr.msk.f32.gmra.mxu0 %vm301_vm0, %v177_v11  ;;  %1978 = vmatmul.mubr.msk.f32.gmra.mxu1 %vm301_vm0, %v241_v12  ;;  %v256_v42 = vld [vmem:[%s2940_s1 + $0x2a0] sm:$0xff]  ;;  %v193_v43 = vld [vmem:[%s2940_s1 + $0xa8] sm:$0xff]  ;;  %v194_v45 = vld [vmem:[%s2940_s1 + $0xb0] sm:$0xff] }
  0x1b   : > { %1884 = vmatprep.mubr.msk.f32.mxu0 %vm301_vm0, %v178_v13  ;;  %1980 = vmatprep.mubr.msk.f32.mxu1 %vm301_vm0, %v242_v14  ;;  %v257_v44 = vld [vmem:[%s2940_s1 + $0x2a8] sm:$0xff]  ;;  %v258_v46 = vld [vmem:[%s2940_s1 + $0x2b0] sm:$0xff]  ;;  %v195_v47 = vld [vmem:[%s2940_s1 + $0xb8] sm:$0xff] }
  0x1c   : > { %v259_v48 = vld [vmem:[%s2940_s1 + $0x2b8] sm:$0xff]  ;;  %v196_v49 = vld [vmem:[%s2940_s1 + $0xc0] sm:$0xff]  ;;  %v197_v51 = vld [vmem:[%s2940_s1 + $0xc8] sm:$0xff] }
  0x1d   : > { %v260_v50 = vld [vmem:[%s2940_s1 + $0x2c0] sm:$0xff]  ;;  %v261_v52 = vld [vmem:[%s2940_s1 + $0x2c8] sm:$0xff]  ;;  %v198_v53 = vld [vmem:[%s2940_s1 + $0xd0] sm:$0xff] }
  0x1e   : > { %1885 = vmatmul.mubr.msk.f32.gmra.mxu0 %vm301_vm0, %v179_v15  ;;  %1981 = vmatmul.mubr.msk.f32.gmra.mxu1 %vm301_vm0, %v243_v16  ;;  %v262_v54 = vld [vmem:[%s2940_s1 + $0x2d0] sm:$0xff]  ;;  %v199_v55 = vld [vmem:[%s2940_s1 + $0xd8] sm:$0xff]  ;;  %v200_v57 = vld [vmem:[%s2940_s1 + $0xe0] sm:$0xff] }
  0x1f   : > { %1887 = vmatprep.mubr.msk.f32.mxu0 %vm301_vm0, %v180_v17  ;;  %1983 = vmatprep.mubr.msk.f32.mxu1 %vm301_vm0, %v244_v18  ;;  %v263_v56 = vld [vmem:[%s2940_s1 + $0x2d8] sm:$0xff]  ;;  %v264_v58 = vld [vmem:[%s2940_s1 + $0x2e0] sm:$0xff]  ;;  %v201_v59 = vld [vmem:[%s2940_s1 + $0xe8] sm:$0xff] }
  0x20   : > { %v265_v60 = vld [vmem:[%s2940_s1 + $0x2e8] sm:$0xff]  ;;  %v202_v61 = vld [vmem:[%s2940_s1 + $0xf0] sm:$0xff]  ;;  %v203_v63 = vld [vmem:[%s2940_s1 + $0xf8] sm:$0xff] }
  0x21   : > { %v266_v62 = vld [vmem:[%s2940_s1 + $0x2f0] sm:$0xff]  ;;  %v267_v0 = vld [vmem:[%s2940_s1 + $0x2f8] sm:$0xff]  ;;  %v204_v1 = vld [vmem:[%s2940_s1 + $0x100] sm:$0xff] }
  0x22   : > { %1888 = vmatmul.mubr.msk.f32.gmra.mxu0 %vm301_vm0, %v181_v19  ;;  %1984 = vmatmul.mubr.msk.f32.gmra.mxu1 %vm301_vm0, %v245_v20  ;;  %v268_v2 = vld [vmem:[%s2940_s1 + $0x300] sm:$0xff]  ;;  %v205_v3 = vld [vmem:[%s2940_s1 + $0x108] sm:$0xff]  ;;  %v206_v5 = vld [vmem:[%s2940_s1 + $0x110] sm:$0xff] }
  0x23   : > { %1890 = vmatprep.mubr.msk.f32.mxu0 %vm301_vm0, %v182_v21  ;;  %1986 = vmatprep.mubr.msk.f32.mxu1 %vm301_vm0, %v246_v22  ;;  %v269_v4 = vld [vmem:[%s2940_s1 + $0x308] sm:$0xff]  ;;  %v270_v6 = vld [vmem:[%s2940_s1 + $0x310] sm:$0xff]  ;;  %v207_v7 = vld [vmem:[%s2940_s1 + $0x118] sm:$0xff] }
  0x24   : > { %v271_v8 = vld [vmem:[%s2940_s1 + $0x318] sm:$0xff]  ;;  %v208_v9 = vld [vmem:[%s2940_s1 + $0x120] sm:$0xff]  ;;  %v209_v11 = vld [vmem:[%s2940_s1 + $0x128] sm:$0xff] }
  0x25   : > { %v272_v10 = vld [vmem:[%s2940_s1 + $0x320] sm:$0xff]  ;;  %v273_v12 = vld [vmem:[%s2940_s1 + $0x328] sm:$0xff]  ;;  %v210_v13 = vld [vmem:[%s2940_s1 + $0x130] sm:$0xff] }
  0x26   : > { %1891 = vmatmul.mubr.msk.f32.gmra.mxu0 %vm301_vm0, %v183_v23  ;;  %1987 = vmatmul.mubr.msk.f32.gmra.mxu1 %vm301_vm0, %v247_v24  ;;  %v274_v14 = vld [vmem:[%s2940_s1 + $0x330] sm:$0xff]  ;;  %v211_v15 = vld [vmem:[%s2940_s1 + $0x138] sm:$0xff]  ;;  %v212_v17 = vld [vmem:[%s2940_s1 + $0x140] sm:$0xff] }
  0x27   : > { %1893 = vmatprep.mubr.msk.f32.mxu0 %vm301_vm0, %v184_v25  ;;  %1989 = vmatprep.mubr.msk.f32.mxu1 %vm301_vm0, %v248_v26  ;;  %v275_v16 = vld [vmem:[%s2940_s1 + $0x338] sm:$0xff]  ;;  %v276_v18 = vld [vmem:[%s2940_s1 + $0x340] sm:$0xff]  ;;  %v213_v19 = vld [vmem:[%s2940_s1 + $0x148] sm:$0xff] }
  0x28   : > { %v277_v20 = vld [vmem:[%s2940_s1 + $0x348] sm:$0xff]  ;;  %v214_v21 = vld [vmem:[%s2940_s1 + $0x150] sm:$0xff]  ;;  %v215_v23 = vld [vmem:[%s2940_s1 + $0x158] sm:$0xff] }
  0x29   : > { %v278_v22 = vld [vmem:[%s2940_s1 + $0x350] sm:$0xff]  ;;  %v279_v24 = vld [vmem:[%s2940_s1 + $0x358] sm:$0xff]  ;;  %v216_v25 = vld [vmem:[%s2940_s1 + $0x160] sm:$0xff] }
  0x2a   : > { %1894 = vmatmul.mubr.msk.f32.gmra.mxu0 %vm301_vm0, %v185_v27  ;;  %1990 = vmatmul.mubr.msk.f32.gmra.mxu1 %vm301_vm0, %v249_v28  ;;  %v280_v26 = vld [vmem:[%s2940_s1 + $0x360] sm:$0xff]  ;;  %v217_v27 = vld [vmem:[%s2940_s1 + $0x168] sm:$0xff] }
  0x2b   : > { %1896 = vmatprep.mubr.msk.f32.mxu0 %vm301_vm0, %v186_v29  ;;  %1992 = vmatprep.mubr.msk.f32.mxu1 %vm301_vm0, %v250_v30  ;;  %v281_v28 = vld [vmem:[%s2940_s1 + $0x368] sm:$0xff]  ;;  %v218_v29 = vld [vmem:[%s2940_s1 + $0x170] sm:$0xff] }
  0x2c   : > { %v282_v30 = vld [vmem:[%s2940_s1 + $0x370] sm:$0xff] }
  0x2e   : > { %1897 = vmatmul.mubr.msk.f32.gmra.mxu0 %vm301_vm0, %v187_v31  ;;  %1993 = vmatmul.mubr.msk.f32.gmra.mxu1 %vm301_vm0, %v251_v32  ;;  %v219_v31 = vld [vmem:[%s2940_s1 + $0x178] sm:$0xff] }
  0x2f   : > { %1899 = vmatprep.mubr.msk.f32.mxu0 %vm301_vm0, %v188_v33  ;;  %1995 = vmatprep.mubr.msk.f32.mxu1 %vm301_vm0, %v252_v34  ;;  %v283_v32 = vld [vmem:[%s2940_s1 + $0x378] sm:$0xff]  ;;  %v220_v33 = vld [vmem:[%s2940_s1 + $0x180] sm:$0xff] }
  0x30   : > { %v284_v34 = vld [vmem:[%s2940_s1 + $0x380] sm:$0xff] }
  0x32   : > { %1900 = vmatmul.mubr.msk.f32.gmra.mxu0 %vm301_vm0, %v189_v35  ;;  %1996 = vmatmul.mubr.msk.f32.gmra.mxu1 %vm301_vm0, %v253_v36  ;;  %v221_v35 = vld [vmem:[%s2940_s1 + $0x188] sm:$0xff] }
  0x33   : > { %1902 = vmatprep.mubr.msk.f32.mxu0 %vm301_vm0, %v190_v37  ;;  %1998 = vmatprep.mubr.msk.f32.mxu1 %vm301_vm0, %v254_v38  ;;  %v285_v36 = vld [vmem:[%s2940_s1 + $0x388] sm:$0xff]  ;;  %v222_v37 = vld [vmem:[%s2940_s1 + $0x190] sm:$0xff] }
  0x34   : > { %v286_v38 = vld [vmem:[%s2940_s1 + $0x390] sm:$0xff] }
  0x36   : > { %1903 = vmatmul.mubr.msk.f32.gmra.mxu0 %vm301_vm0, %v191_v39  ;;  %1999 = vmatmul.mubr.msk.f32.gmra.mxu1 %vm301_vm0, %v255_v40  ;;  %v223_v39 = vld [vmem:[%s2940_s1 + $0x198] sm:$0xff] }
  0x37   : > { %1905 = vmatprep.mubr.msk.f32.mxu0 %vm301_vm0, %v192_v41  ;;  %2001 = vmatprep.mubr.msk.f32.mxu1 %vm301_vm0, %v256_v42  ;;  %v287_v40 = vld [vmem:[%s2940_s1 + $0x398] sm:$0xff]  ;;  %v224_v41 = vld [vmem:[%s2940_s1 + $0x1a0] sm:$0xff] }
  0x38   : > { %v288_v42 = vld [vmem:[%s2940_s1 + $0x3a0] sm:$0xff] }
  0x3a   : > { %1906 = vmatmul.mubr.msk.f32.gmra.mxu0 %vm301_vm0, %v193_v43  ;;  %2002 = vmatmul.mubr.msk.f32.gmra.mxu1 %vm301_vm0, %v257_v44  ;;  %v225_v43 = vld [vmem:[%s2940_s1 + $0x1a8] sm:$0xff] }
  0x3b   : > { %1908 = vmatprep.mubr.msk.f32.mxu0 %vm301_vm0, %v194_v45  ;;  %2004 = vmatprep.mubr.msk.f32.mxu1 %vm301_vm0, %v258_v46  ;;  %v289_v44 = vld [vmem:[%s2940_s1 + $0x3a8] sm:$0xff]  ;;  %v226_v45 = vld [vmem:[%s2940_s1 + $0x1b0] sm:$0xff] }
  0x3c   : > { %v290_v46 = vld [vmem:[%s2940_s1 + $0x3b0] sm:$0xff] }
  0x3e   : > { %1909 = vmatmul.mubr.msk.f32.gmra.mxu0 %vm301_vm0, %v195_v47  ;;  %2005 = vmatmul.mubr.msk.f32.gmra.mxu1 %vm301_vm0, %v259_v48  ;;  %v227_v47 = vld [vmem:[%s2940_s1 + $0x1b8] sm:$0xff] }
  0x3f   : > { %1911 = vmatprep.mubr.msk.f32.mxu0 %vm301_vm0, %v196_v49  ;;  %2007 = vmatprep.mubr.msk.f32.mxu1 %vm301_vm0, %v260_v50  ;;  %v291_v48 = vld [vmem:[%s2940_s1 + $0x3b8] sm:$0xff]  ;;  %v228_v49 = vld [vmem:[%s2940_s1 + $0x1c0] sm:$0xff] }
  0x40   : > { %v292_v50 = vld [vmem:[%s2940_s1 + $0x3c0] sm:$0xff] }
  0x42   : > { %1912 = vmatmul.mubr.msk.f32.gmra.mxu0 %vm301_vm0, %v197_v51  ;;  %2008 = vmatmul.mubr.msk.f32.gmra.mxu1 %vm301_vm0, %v261_v52  ;;  %v229_v51 = vld [vmem:[%s2940_s1 + $0x1c8] sm:$0xff] }
  0x43   : > { %1914 = vmatprep.mubr.msk.f32.mxu0 %vm301_vm0, %v198_v53  ;;  %2010 = vmatprep.mubr.msk.f32.mxu1 %vm301_vm0, %v262_v54  ;;  %v293_v52 = vld [vmem:[%s2940_s1 + $0x3c8] sm:$0xff]  ;;  %v230_v53 = vld [vmem:[%s2940_s1 + $0x1d0] sm:$0xff] }
  0x44   : > { %v294_v54 = vld [vmem:[%s2940_s1 + $0x3d0] sm:$0xff] }
  0x46   : > { %1915 = vmatmul.mubr.msk.f32.gmra.mxu0 %vm301_vm0, %v199_v55  ;;  %2011 = vmatmul.mubr.msk.f32.gmra.mxu1 %vm301_vm0, %v263_v56  ;;  %v231_v55 = vld [vmem:[%s2940_s1 + $0x1d8] sm:$0xff] }
  0x47   : > { %1917 = vmatprep.mubr.msk.f32.mxu0 %vm301_vm0, %v200_v57  ;;  %2013 = vmatprep.mubr.msk.f32.mxu1 %vm301_vm0, %v264_v58  ;;  %v295_v56 = vld [vmem:[%s2940_s1 + $0x3d8] sm:$0xff]  ;;  %v232_v57 = vld [vmem:[%s2940_s1 + $0x1e0] sm:$0xff] }
  0x48   : > { %v296_v58 = vld [vmem:[%s2940_s1 + $0x3e0] sm:$0xff] }
  0x4a   : > { %1918 = vmatmul.mubr.msk.f32.gmra.mxu0 %vm301_vm0, %v201_v59  ;;  %2014 = vmatmul.mubr.msk.f32.gmra.mxu1 %vm301_vm0, %v265_v60  ;;  %v233_v59 = vld [vmem:[%s2940_s1 + $0x1e8] sm:$0xff] }
  0x4b   : > { %1920 = vmatprep.mubr.msk.f32.mxu0 %vm301_vm0, %v202_v61  ;;  %2016 = vmatprep.mubr.msk.f32.mxu1 %vm301_vm0, %v266_v62  ;;  %v297_v60 = vld [vmem:[%s2940_s1 + $0x3e8] sm:$0xff]  ;;  %v234_v61 = vld [vmem:[%s2940_s1 + $0x1f0] sm:$0xff] }
  0x4c   : > { %v298_v62 = vld [vmem:[%s2940_s1 + $0x3f0] sm:$0xff] }
  0x4e   : > { %1921 = vmatmul.mubr.msk.f32.gmra.mxu0 %vm301_vm0, %v203_v63  ;;  %2017 = vmatmul.mubr.msk.f32.gmra.mxu1 %vm301_vm0, %v267_v0  ;;  %v235_v63 = vld [vmem:[%s2940_s1 + $0x1f8] sm:$0xff] }
  0x4f   : > { %1923 = vmatprep.mubr.msk.f32.mxu0 %vm301_vm0, %v204_v1  ;;  %2019 = vmatprep.mubr.msk.f32.mxu1 %vm301_vm0, %v268_v2  ;;  %v299_v0 = vld [vmem:[%s2940_s1 + $0x3f8] sm:$0xff] }
  0x52   : > { %1924 = vmatmul.mubr.msk.f32.gmra.mxu0 %vm301_vm0, %v205_v3  ;;  %2020 = vmatmul.mubr.msk.f32.gmra.mxu1 %vm301_vm0, %v269_v4 }
  0x53   : > { %1926 = vmatprep.mubr.msk.f32.mxu0 %vm301_vm0, %v206_v5  ;;  %2022 = vmatprep.mubr.msk.f32.mxu1 %vm301_vm0, %v270_v6 }
  0x56   : > { %1927 = vmatmul.mubr.msk.f32.gmra.mxu0 %vm301_vm0, %v207_v7  ;;  %2023 = vmatmul.mubr.msk.f32.gmra.mxu1 %vm301_vm0, %v271_v8 }
  0x57   : > { %1929 = vmatprep.mubr.msk.f32.mxu0 %vm301_vm0, %v208_v9  ;;  %2025 = vmatprep.mubr.msk.f32.mxu1 %vm301_vm0, %v272_v10 }
  0x5a   : > { %1930 = vmatmul.mubr.msk.f32.gmra.mxu0 %vm301_vm0, %v209_v11  ;;  %2026 = vmatmul.mubr.msk.f32.gmra.mxu1 %vm301_vm0, %v273_v12 }
  0x5b   : > { %1932 = vmatprep.mubr.msk.f32.mxu0 %vm301_vm0, %v210_v13  ;;  %2028 = vmatprep.mubr.msk.f32.mxu1 %vm301_vm0, %v274_v14 }
  0x5e   : > { %1933 = vmatmul.mubr.msk.f32.gmra.mxu0 %vm301_vm0, %v211_v15  ;;  %2029 = vmatmul.mubr.msk.f32.gmra.mxu1 %vm301_vm0, %v275_v16 }
  0x5f   : > { %1935 = vmatprep.mubr.msk.f32.mxu0 %vm301_vm0, %v212_v17  ;;  %2031 = vmatprep.mubr.msk.f32.mxu1 %vm301_vm0, %v276_v18 }
  0x62   : > { %1936 = vmatmul.mubr.msk.f32.gmra.mxu0 %vm301_vm0, %v213_v19  ;;  %2032 = vmatmul.mubr.msk.f32.gmra.mxu1 %vm301_vm0, %v277_v20 }
  0x63   : > { %1938 = vmatprep.mubr.msk.f32.mxu0 %vm301_vm0, %v214_v21  ;;  %2034 = vmatprep.mubr.msk.f32.mxu1 %vm301_vm0, %v278_v22 }
  0x66   : > { %1939 = vmatmul.mubr.msk.f32.gmra.mxu0 %vm301_vm0, %v215_v23  ;;  %2035 = vmatmul.mubr.msk.f32.gmra.mxu1 %vm301_vm0, %v279_v24 }
  0x67   : > { %1941 = vmatprep.mubr.msk.f32.mxu0 %vm301_vm0, %v216_v25  ;;  %2037 = vmatprep.mubr.msk.f32.mxu1 %vm301_vm0, %v280_v26 }
  0x6a   : > { %1942 = vmatmul.mubr.msk.f32.gmra.mxu0 %vm301_vm0, %v217_v27  ;;  %2038 = vmatmul.mubr.msk.f32.gmra.mxu1 %vm301_vm0, %v281_v28 }
  0x6b   : > { %1944 = vmatprep.mubr.msk.f32.mxu0 %vm301_vm0, %v218_v29  ;;  %2040 = vmatprep.mubr.msk.f32.mxu1 %vm301_vm0, %v282_v30 }
  0x6e   : > { %1945 = vmatmul.mubr.msk.f32.gmra.mxu0 %vm301_vm0, %v219_v31  ;;  %2041 = vmatmul.mubr.msk.f32.gmra.mxu1 %vm301_vm0, %v283_v32 }
  0x6f   : > { %1947 = vmatprep.mubr.msk.f32.mxu0 %vm301_vm0, %v220_v33  ;;  %2043 = vmatprep.mubr.msk.f32.mxu1 %vm301_vm0, %v284_v34 }
  0x72   : > { %1948 = vmatmul.mubr.msk.f32.gmra.mxu0 %vm301_vm0, %v221_v35  ;;  %2044 = vmatmul.mubr.msk.f32.gmra.mxu1 %vm301_vm0, %v285_v36 }
  0x73   : > { %1950 = vmatprep.mubr.msk.f32.mxu0 %vm301_vm0, %v222_v37  ;;  %2046 = vmatprep.mubr.msk.f32.mxu1 %vm301_vm0, %v286_v38 }
  0x76   : > { %1951 = vmatmul.mubr.msk.f32.gmra.mxu0 %vm301_vm0, %v223_v39  ;;  %2047 = vmatmul.mubr.msk.f32.gmra.mxu1 %vm301_vm0, %v287_v40 }
  0x77   : > { %1953 = vmatprep.mubr.msk.f32.mxu0 %vm301_vm0, %v224_v41  ;;  %2049 = vmatprep.mubr.msk.f32.mxu1 %vm301_vm0, %v288_v42 }
  0x7a   : > { %1954 = vmatmul.mubr.msk.f32.gmra.mxu0 %vm301_vm0, %v225_v43  ;;  %2050 = vmatmul.mubr.msk.f32.gmra.mxu1 %vm301_vm0, %v289_v44 }
  0x7b   : > { %1956 = vmatprep.mubr.msk.f32.mxu0 %vm301_vm0, %v226_v45  ;;  %2052 = vmatprep.mubr.msk.f32.mxu1 %vm301_vm0, %v290_v46 }
  0x7e   : > { %1957 = vmatmul.mubr.msk.f32.gmra.mxu0 %vm301_vm0, %v227_v47  ;;  %2053 = vmatmul.mubr.msk.f32.gmra.mxu1 %vm301_vm0, %v291_v48 }
  0x7f   : > { %1959 = vmatprep.mubr.msk.f32.mxu0 %vm301_vm0, %v228_v49  ;;  %2055 = vmatprep.mubr.msk.f32.mxu1 %vm301_vm0, %v292_v50 }
  0x82   : > { %1960 = vmatmul.mubr.msk.f32.gmra.mxu0 %vm301_vm0, %v229_v51  ;;  %2056 = vmatmul.mubr.msk.f32.gmra.mxu1 %vm301_vm0, %v293_v52 }
  0x83   : > { %1962 = vmatprep.mubr.msk.f32.mxu0 %vm301_vm0, %v230_v53  ;;  %2058 = vmatprep.mubr.msk.f32.mxu1 %vm301_vm0, %v294_v54 }
  0x86   : > { %1963 = vmatmul.mubr.msk.f32.gmra.mxu0 %vm301_vm0, %v231_v55  ;;  %2059 = vmatmul.mubr.msk.f32.gmra.mxu1 %vm301_vm0, %v295_v56 }
  0x87   : > { %1965 = vmatprep.mubr.msk.f32.mxu0 %vm301_vm0, %v232_v57  ;;  %2061 = vmatprep.mubr.msk.f32.mxu1 %vm301_vm0, %v296_v58 }
  0x8a   : > { %1966 = vmatmul.mubr.msk.f32.gmra.mxu0 %vm301_vm0, %v233_v59  ;;  %2062 = vmatmul.mubr.msk.f32.gmra.mxu1 %vm301_vm0, %v297_v60 }
  0x8b   : > { %1968 = vmatprep.mubr.msk.f32.mxu0 %vm301_vm0, %v234_v61  ;;  %2064 = vmatprep.mubr.msk.f32.mxu1 %vm301_vm0, %v298_v62 }
  0x8e   : > { %1969 = vmatmul.mubr.msk.f32.gmra.mxu0 %vm301_vm0, %v235_v63  ;;  %2065 = vmatmul.mubr.msk.f32.gmra.mxu1 %vm301_vm0, %v299_v0 }
  0xd2   : > { %v1877_v1 = vpop.f32.mrf.mxu0  ;;  %v1973_v2 = vpop.f32.mrf.mxu1 }
  0xd3   : > { %1397 = vst.msk [vmem:[%s2672_s8 + $0x8] sm:$0xff] %vm1395_vm2, %v1877_v1  ;;  %1461 = vst.msk [vmem:[%s2672_s8 + $0x208] sm:$0xff] %vm1395_vm2, %v1973_v2 }
  0xd4   : > { %v756_v3 = vpop.f32.mrf.mxu0  ;;  %v1076_v4 = vpop.f32.mrf.mxu1 }
  0xd5   : > { %1396 = vst.msk [vmem:[%s2672_s8] sm:$0xff] %vm1395_vm2, %v756_v3  ;;  %1460 = vst.msk [vmem:[%s2672_s8 + $0x200] sm:$0xff] %vm1395_vm2, %v1076_v4 }
  0xd6   : > { %v1880_v5 = vpop.f32.mrf.mxu0  ;;  %v1976_v6 = vpop.f32.mrf.mxu1 }
  0xd7   : > { %1399 = vst.msk [vmem:[%s2672_s8 + $0x18] sm:$0xff] %vm1395_vm2, %v1880_v5  ;;  %1463 = vst.msk [vmem:[%s2672_s8 + $0x218] sm:$0xff] %vm1395_vm2, %v1976_v6 }
  0xd8   : > { %v766_v7 = vpop.f32.mrf.mxu0  ;;  %v1086_v8 = vpop.f32.mrf.mxu1 }
  0xd9   : > { %1398 = vst.msk [vmem:[%s2672_s8 + $0x10] sm:$0xff] %vm1395_vm2, %v766_v7  ;;  %1462 = vst.msk [vmem:[%s2672_s8 + $0x210] sm:$0xff] %vm1395_vm2, %v1086_v8 }
  0xda   : > { %v1883_v9 = vpop.f32.mrf.mxu0  ;;  %v1979_v10 = vpop.f32.mrf.mxu1 }
  0xdb   : > { %1401 = vst.msk [vmem:[%s2672_s8 + $0x28] sm:$0xff] %vm1395_vm2, %v1883_v9  ;;  %1465 = vst.msk [vmem:[%s2672_s8 + $0x228] sm:$0xff] %vm1395_vm2, %v1979_v10 }
  0xdc   : > { %v776_v11 = vpop.f32.mrf.mxu0  ;;  %v1096_v12 = vpop.f32.mrf.mxu1 }
  0xdd   : > { %1400 = vst.msk [vmem:[%s2672_s8 + $0x20] sm:$0xff] %vm1395_vm2, %v776_v11  ;;  %1464 = vst.msk [vmem:[%s2672_s8 + $0x220] sm:$0xff] %vm1395_vm2, %v1096_v12 }
  0xde   : > { %v1886_v13 = vpop.f32.mrf.mxu0  ;;  %v1982_v14 = vpop.f32.mrf.mxu1 }
  0xdf   : > { %1403 = vst.msk [vmem:[%s2672_s8 + $0x38] sm:$0xff] %vm1395_vm2, %v1886_v13  ;;  %1467 = vst.msk [vmem:[%s2672_s8 + $0x238] sm:$0xff] %vm1395_vm2, %v1982_v14 }
  0xe0   : > { %v786_v15 = vpop.f32.mrf.mxu0  ;;  %v1106_v16 = vpop.f32.mrf.mxu1 }
  0xe1   : > { %1402 = vst.msk [vmem:[%s2672_s8 + $0x30] sm:$0xff] %vm1395_vm2, %v786_v15  ;;  %1466 = vst.msk [vmem:[%s2672_s8 + $0x230] sm:$0xff] %vm1395_vm2, %v1106_v16 }
  0xe2   : > { %v1889_v17 = vpop.f32.mrf.mxu0  ;;  %v1985_v18 = vpop.f32.mrf.mxu1 }
  0xe3   : > { %1405 = vst.msk [vmem:[%s2672_s8 + $0x48] sm:$0xff] %vm1395_vm2, %v1889_v17  ;;  %1469 = vst.msk [vmem:[%s2672_s8 + $0x248] sm:$0xff] %vm1395_vm2, %v1985_v18 }
  0xe4   : > { %v796_v19 = vpop.f32.mrf.mxu0  ;;  %v1116_v20 = vpop.f32.mrf.mxu1 }
  0xe5   : > { %1404 = vst.msk [vmem:[%s2672_s8 + $0x40] sm:$0xff] %vm1395_vm2, %v796_v19  ;;  %1468 = vst.msk [vmem:[%s2672_s8 + $0x240] sm:$0xff] %vm1395_vm2, %v1116_v20 }
  0xe6   : > { %v1892_v21 = vpop.f32.mrf.mxu0  ;;  %v1988_v22 = vpop.f32.mrf.mxu1 }
  0xe7   : > { %1407 = vst.msk [vmem:[%s2672_s8 + $0x58] sm:$0xff] %vm1395_vm2, %v1892_v21  ;;  %1471 = vst.msk [vmem:[%s2672_s8 + $0x258] sm:$0xff] %vm1395_vm2, %v1988_v22 }
  0xe8   : > { %v806_v23 = vpop.f32.mrf.mxu0  ;;  %v1126_v24 = vpop.f32.mrf.mxu1 }
  0xe9   : > { %1406 = vst.msk [vmem:[%s2672_s8 + $0x50] sm:$0xff] %vm1395_vm2, %v806_v23  ;;  %1470 = vst.msk [vmem:[%s2672_s8 + $0x250] sm:$0xff] %vm1395_vm2, %v1126_v24 }
  0xea   : > { %v1895_v25 = vpop.f32.mrf.mxu0  ;;  %v1991_v26 = vpop.f32.mrf.mxu1 }
  0xeb   : > { %1409 = vst.msk [vmem:[%s2672_s8 + $0x68] sm:$0xff] %vm1395_vm2, %v1895_v25  ;;  %1473 = vst.msk [vmem:[%s2672_s8 + $0x268] sm:$0xff] %vm1395_vm2, %v1991_v26 }
  0xec   : > { %v816_v27 = vpop.f32.mrf.mxu0  ;;  %v1136_v28 = vpop.f32.mrf.mxu1 }
  0xed   : > { %1408 = vst.msk [vmem:[%s2672_s8 + $0x60] sm:$0xff] %vm1395_vm2, %v816_v27  ;;  %1472 = vst.msk [vmem:[%s2672_s8 + $0x260] sm:$0xff] %vm1395_vm2, %v1136_v28 }
  0xee   : > { %v1898_v29 = vpop.f32.mrf.mxu0  ;;  %v1994_v30 = vpop.f32.mrf.mxu1 }
  0xef   : > { %1411 = vst.msk [vmem:[%s2672_s8 + $0x78] sm:$0xff] %vm1395_vm2, %v1898_v29  ;;  %1475 = vst.msk [vmem:[%s2672_s8 + $0x278] sm:$0xff] %vm1395_vm2, %v1994_v30 }
  0xf0   : > { %v826_v31 = vpop.f32.mrf.mxu0  ;;  %v1146_v32 = vpop.f32.mrf.mxu1 }
  0xf1   : > { %1410 = vst.msk [vmem:[%s2672_s8 + $0x70] sm:$0xff] %vm1395_vm2, %v826_v31  ;;  %1474 = vst.msk [vmem:[%s2672_s8 + $0x270] sm:$0xff] %vm1395_vm2, %v1146_v32 }
  0xf2   : > { %v1901_v33 = vpop.f32.mrf.mxu0  ;;  %v1997_v34 = vpop.f32.mrf.mxu1 }
  0xf3   : > { %1413 = vst.msk [vmem:[%s2672_s8 + $0x88] sm:$0xff] %vm1395_vm2, %v1901_v33  ;;  %1477 = vst.msk [vmem:[%s2672_s8 + $0x288] sm:$0xff] %vm1395_vm2, %v1997_v34 }
  0xf4   : > { %v836_v35 = vpop.f32.mrf.mxu0  ;;  %v1156_v36 = vpop.f32.mrf.mxu1 }
  0xf5   : > { %1412 = vst.msk [vmem:[%s2672_s8 + $0x80] sm:$0xff] %vm1395_vm2, %v836_v35  ;;  %1476 = vst.msk [vmem:[%s2672_s8 + $0x280] sm:$0xff] %vm1395_vm2, %v1156_v36 }
  0xf6   : > { %v1904_v37 = vpop.f32.mrf.mxu0  ;;  %v2000_v38 = vpop.f32.mrf.mxu1 }
  0xf7   : > { %1415 = vst.msk [vmem:[%s2672_s8 + $0x98] sm:$0xff] %vm1395_vm2, %v1904_v37  ;;  %1479 = vst.msk [vmem:[%s2672_s8 + $0x298] sm:$0xff] %vm1395_vm2, %v2000_v38 }
  0xf8   : > { %v846_v39 = vpop.f32.mrf.mxu0  ;;  %v1166_v40 = vpop.f32.mrf.mxu1 }
  0xf9   : > { %1414 = vst.msk [vmem:[%s2672_s8 + $0x90] sm:$0xff] %vm1395_vm2, %v846_v39  ;;  %1478 = vst.msk [vmem:[%s2672_s8 + $0x290] sm:$0xff] %vm1395_vm2, %v1166_v40 }
  0xfa   : > { %v1907_v41 = vpop.f32.mrf.mxu0  ;;  %v2003_v42 = vpop.f32.mrf.mxu1 }
  0xfb   : > { %1417 = vst.msk [vmem:[%s2672_s8 + $0xa8] sm:$0xff] %vm1395_vm2, %v1907_v41  ;;  %1481 = vst.msk [vmem:[%s2672_s8 + $0x2a8] sm:$0xff] %vm1395_vm2, %v2003_v42 }
  0xfc   : > { %v856_v43 = vpop.f32.mrf.mxu0  ;;  %v1176_v44 = vpop.f32.mrf.mxu1 }
  0xfd   : > { %1416 = vst.msk [vmem:[%s2672_s8 + $0xa0] sm:$0xff] %vm1395_vm2, %v856_v43  ;;  %1480 = vst.msk [vmem:[%s2672_s8 + $0x2a0] sm:$0xff] %vm1395_vm2, %v1176_v44 }
  0xfe   : > { %v1910_v45 = vpop.f32.mrf.mxu0  ;;  %v2006_v46 = vpop.f32.mrf.mxu1 }
  0xff   : > { %1419 = vst.msk [vmem:[%s2672_s8 + $0xb8] sm:$0xff] %vm1395_vm2, %v1910_v45  ;;  %1483 = vst.msk [vmem:[%s2672_s8 + $0x2b8] sm:$0xff] %vm1395_vm2, %v2006_v46 }
 0x100   : > { %v866_v47 = vpop.f32.mrf.mxu0  ;;  %v1186_v48 = vpop.f32.mrf.mxu1 }
 0x101   : > { %1418 = vst.msk [vmem:[%s2672_s8 + $0xb0] sm:$0xff] %vm1395_vm2, %v866_v47  ;;  %1482 = vst.msk [vmem:[%s2672_s8 + $0x2b0] sm:$0xff] %vm1395_vm2, %v1186_v48 }
 0x102   : > { %v1913_v49 = vpop.f32.mrf.mxu0  ;;  %v2009_v50 = vpop.f32.mrf.mxu1 }
 0x103   : > { %1421 = vst.msk [vmem:[%s2672_s8 + $0xc8] sm:$0xff] %vm1395_vm2, %v1913_v49  ;;  %1485 = vst.msk [vmem:[%s2672_s8 + $0x2c8] sm:$0xff] %vm1395_vm2, %v2009_v50 }
 0x104   : > { %v876_v51 = vpop.f32.mrf.mxu0  ;;  %v1196_v52 = vpop.f32.mrf.mxu1 }
 0x105   : > { %1420 = vst.msk [vmem:[%s2672_s8 + $0xc0] sm:$0xff] %vm1395_vm2, %v876_v51  ;;  %1484 = vst.msk [vmem:[%s2672_s8 + $0x2c0] sm:$0xff] %vm1395_vm2, %v1196_v52 }
 0x106   : > { %v1916_v53 = vpop.f32.mrf.mxu0  ;;  %v2012_v54 = vpop.f32.mrf.mxu1 }
 0x107   : > { %1423 = vst.msk [vmem:[%s2672_s8 + $0xd8] sm:$0xff] %vm1395_vm2, %v1916_v53  ;;  %1487 = vst.msk [vmem:[%s2672_s8 + $0x2d8] sm:$0xff] %vm1395_vm2, %v2012_v54 }
 0x108   : > { %v886_v55 = vpop.f32.mrf.mxu0  ;;  %v1206_v56 = vpop.f32.mrf.mxu1 }
 0x109   : > { %1422 = vst.msk [vmem:[%s2672_s8 + $0xd0] sm:$0xff] %vm1395_vm2, %v886_v55  ;;  %1486 = vst.msk [vmem:[%s2672_s8 + $0x2d0] sm:$0xff] %vm1395_vm2, %v1206_v56 }
 0x10a   : > { %v1919_v57 = vpop.f32.mrf.mxu0  ;;  %v2015_v58 = vpop.f32.mrf.mxu1 }
 0x10b   : > { %1425 = vst.msk [vmem:[%s2672_s8 + $0xe8] sm:$0xff] %vm1395_vm2, %v1919_v57  ;;  %1489 = vst.msk [vmem:[%s2672_s8 + $0x2e8] sm:$0xff] %vm1395_vm2, %v2015_v58 }
 0x10c   : > { %v896_v59 = vpop.f32.mrf.mxu0  ;;  %v1216_v60 = vpop.f32.mrf.mxu1 }
 0x10d   : > { %1424 = vst.msk [vmem:[%s2672_s8 + $0xe0] sm:$0xff] %vm1395_vm2, %v896_v59  ;;  %1488 = vst.msk [vmem:[%s2672_s8 + $0x2e0] sm:$0xff] %vm1395_vm2, %v1216_v60 }
 0x10e   : > { %v1922_v61 = vpop.f32.mrf.mxu0  ;;  %v2018_v62 = vpop.f32.mrf.mxu1 }
 0x10f   : > { %1427 = vst.msk [vmem:[%s2672_s8 + $0xf8] sm:$0xff] %vm1395_vm2, %v1922_v61  ;;  %1491 = vst.msk [vmem:[%s2672_s8 + $0x2f8] sm:$0xff] %vm1395_vm2, %v2018_v62 }
 0x110   : > { %v906_v63 = vpop.f32.mrf.mxu0  ;;  %v1226_v0 = vpop.f32.mrf.mxu1 }
 0x111   : > { %1426 = vst.msk [vmem:[%s2672_s8 + $0xf0] sm:$0xff] %vm1395_vm2, %v906_v63  ;;  %1490 = vst.msk [vmem:[%s2672_s8 + $0x2f0] sm:$0xff] %vm1395_vm2, %v1226_v0 }
 0x112   : > { %v1925_v1 = vpop.f32.mrf.mxu0  ;;  %v2021_v2 = vpop.f32.mrf.mxu1 }
 0x113   : > { %1429 = vst.msk [vmem:[%s2672_s8 + $0x108] sm:$0xff] %vm1395_vm2, %v1925_v1  ;;  %1493 = vst.msk [vmem:[%s2672_s8 + $0x308] sm:$0xff] %vm1395_vm2, %v2021_v2 }
 0x114   : > { %v916_v3 = vpop.f32.mrf.mxu0  ;;  %v1236_v4 = vpop.f32.mrf.mxu1 }
 0x115   : > { %1428 = vst.msk [vmem:[%s2672_s8 + $0x100] sm:$0xff] %vm1395_vm2, %v916_v3  ;;  %1492 = vst.msk [vmem:[%s2672_s8 + $0x300] sm:$0xff] %vm1395_vm2, %v1236_v4 }
 0x116   : > { %v1928_v5 = vpop.f32.mrf.mxu0  ;;  %v2024_v6 = vpop.f32.mrf.mxu1 }
 0x117   : > { %1431 = vst.msk [vmem:[%s2672_s8 + $0x118] sm:$0xff] %vm1395_vm2, %v1928_v5  ;;  %1495 = vst.msk [vmem:[%s2672_s8 + $0x318] sm:$0xff] %vm1395_vm2, %v2024_v6 }
 0x118   : > { %v926_v7 = vpop.f32.mrf.mxu0  ;;  %v1246_v8 = vpop.f32.mrf.mxu1 }
 0x119   : > { %1430 = vst.msk [vmem:[%s2672_s8 + $0x110] sm:$0xff] %vm1395_vm2, %v926_v7  ;;  %1494 = vst.msk [vmem:[%s2672_s8 + $0x310] sm:$0xff] %vm1395_vm2, %v1246_v8 }
 0x11a   : > { %v1931_v9 = vpop.f32.mrf.mxu0  ;;  %v2027_v10 = vpop.f32.mrf.mxu1 }
 0x11b   : > { %1433 = vst.msk [vmem:[%s2672_s8 + $0x128] sm:$0xff] %vm1395_vm2, %v1931_v9  ;;  %1497 = vst.msk [vmem:[%s2672_s8 + $0x328] sm:$0xff] %vm1395_vm2, %v2027_v10 }
 0x11c   : > { %v936_v11 = vpop.f32.mrf.mxu0  ;;  %v1256_v12 = vpop.f32.mrf.mxu1 }
 0x11d   : > { %1432 = vst.msk [vmem:[%s2672_s8 + $0x120] sm:$0xff] %vm1395_vm2, %v936_v11  ;;  %1496 = vst.msk [vmem:[%s2672_s8 + $0x320] sm:$0xff] %vm1395_vm2, %v1256_v12 }
 0x11e   : > { %v1934_v13 = vpop.f32.mrf.mxu0  ;;  %v2030_v14 = vpop.f32.mrf.mxu1 }
 0x11f   : > { %1435 = vst.msk [vmem:[%s2672_s8 + $0x138] sm:$0xff] %vm1395_vm2, %v1934_v13  ;;  %1499 = vst.msk [vmem:[%s2672_s8 + $0x338] sm:$0xff] %vm1395_vm2, %v2030_v14 }
 0x120   : > { %v946_v15 = vpop.f32.mrf.mxu0  ;;  %v1266_v16 = vpop.f32.mrf.mxu1 }
 0x121   : > { %1434 = vst.msk [vmem:[%s2672_s8 + $0x130] sm:$0xff] %vm1395_vm2, %v946_v15  ;;  %1498 = vst.msk [vmem:[%s2672_s8 + $0x330] sm:$0xff] %vm1395_vm2, %v1266_v16 }
 0x122   : > { %v1937_v17 = vpop.f32.mrf.mxu0  ;;  %v2033_v18 = vpop.f32.mrf.mxu1 }
 0x123   : > { %1437 = vst.msk [vmem:[%s2672_s8 + $0x148] sm:$0xff] %vm1395_vm2, %v1937_v17  ;;  %1501 = vst.msk [vmem:[%s2672_s8 + $0x348] sm:$0xff] %vm1395_vm2, %v2033_v18 }
 0x124   : > { %v956_v19 = vpop.f32.mrf.mxu0  ;;  %v1276_v20 = vpop.f32.mrf.mxu1 }
 0x125   : > { %1436 = vst.msk [vmem:[%s2672_s8 + $0x140] sm:$0xff] %vm1395_vm2, %v956_v19  ;;  %1500 = vst.msk [vmem:[%s2672_s8 + $0x340] sm:$0xff] %vm1395_vm2, %v1276_v20 }
 0x126   : > { %v1940_v21 = vpop.f32.mrf.mxu0  ;;  %v2036_v22 = vpop.f32.mrf.mxu1 }
 0x127   : > { %1439 = vst.msk [vmem:[%s2672_s8 + $0x158] sm:$0xff] %vm1395_vm2, %v1940_v21  ;;  %1503 = vst.msk [vmem:[%s2672_s8 + $0x358] sm:$0xff] %vm1395_vm2, %v2036_v22 }
 0x128   : > { %v966_v23 = vpop.f32.mrf.mxu0  ;;  %v1286_v24 = vpop.f32.mrf.mxu1 }
 0x129   : > { %1438 = vst.msk [vmem:[%s2672_s8 + $0x150] sm:$0xff] %vm1395_vm2, %v966_v23  ;;  %1502 = vst.msk [vmem:[%s2672_s8 + $0x350] sm:$0xff] %vm1395_vm2, %v1286_v24 }
 0x12a   : > { %v1943_v25 = vpop.f32.mrf.mxu0  ;;  %v2039_v26 = vpop.f32.mrf.mxu1 }
 0x12b   : > { %1441 = vst.msk [vmem:[%s2672_s8 + $0x168] sm:$0xff] %vm1395_vm2, %v1943_v25  ;;  %1505 = vst.msk [vmem:[%s2672_s8 + $0x368] sm:$0xff] %vm1395_vm2, %v2039_v26 }
 0x12c   : > { %v976_v27 = vpop.f32.mrf.mxu0  ;;  %v1296_v28 = vpop.f32.mrf.mxu1 }
 0x12d   : > { %1440 = vst.msk [vmem:[%s2672_s8 + $0x160] sm:$0xff] %vm1395_vm2, %v976_v27  ;;  %1504 = vst.msk [vmem:[%s2672_s8 + $0x360] sm:$0xff] %vm1395_vm2, %v1296_v28 }
 0x12e   : > { %v1946_v29 = vpop.f32.mrf.mxu0  ;;  %v2042_v30 = vpop.f32.mrf.mxu1 }
 0x12f   : > { %1443 = vst.msk [vmem:[%s2672_s8 + $0x178] sm:$0xff] %vm1395_vm2, %v1946_v29  ;;  %1507 = vst.msk [vmem:[%s2672_s8 + $0x378] sm:$0xff] %vm1395_vm2, %v2042_v30 }
 0x130   : > { %v986_v31 = vpop.f32.mrf.mxu0  ;;  %v1306_v32 = vpop.f32.mrf.mxu1 }
 0x131   : > { %1442 = vst.msk [vmem:[%s2672_s8 + $0x170] sm:$0xff] %vm1395_vm2, %v986_v31  ;;  %1506 = vst.msk [vmem:[%s2672_s8 + $0x370] sm:$0xff] %vm1395_vm2, %v1306_v32 }
 0x132   : > { %v1949_v33 = vpop.f32.mrf.mxu0  ;;  %v2045_v34 = vpop.f32.mrf.mxu1 }
 0x133   : > { %1445 = vst.msk [vmem:[%s2672_s8 + $0x188] sm:$0xff] %vm1395_vm2, %v1949_v33  ;;  %1509 = vst.msk [vmem:[%s2672_s8 + $0x388] sm:$0xff] %vm1395_vm2, %v2045_v34 }
 0x134   : > { %v996_v35 = vpop.f32.mrf.mxu0  ;;  %v1316_v36 = vpop.f32.mrf.mxu1 }
 0x135   : > { %1444 = vst.msk [vmem:[%s2672_s8 + $0x180] sm:$0xff] %vm1395_vm2, %v996_v35  ;;  %1508 = vst.msk [vmem:[%s2672_s8 + $0x380] sm:$0xff] %vm1395_vm2, %v1316_v36 }
 0x136   : > { %v1952_v37 = vpop.f32.mrf.mxu0  ;;  %v2048_v38 = vpop.f32.mrf.mxu1 }
 0x137   : > { %1447 = vst.msk [vmem:[%s2672_s8 + $0x198] sm:$0xff] %vm1395_vm2, %v1952_v37  ;;  %1511 = vst.msk [vmem:[%s2672_s8 + $0x398] sm:$0xff] %vm1395_vm2, %v2048_v38 }
 0x138   : > { %v1006_v39 = vpop.f32.mrf.mxu0  ;;  %v1326_v40 = vpop.f32.mrf.mxu1 }
 0x139   : > { %1446 = vst.msk [vmem:[%s2672_s8 + $0x190] sm:$0xff] %vm1395_vm2, %v1006_v39  ;;  %1510 = vst.msk [vmem:[%s2672_s8 + $0x390] sm:$0xff] %vm1395_vm2, %v1326_v40 }
 0x13a   : > { %v1955_v41 = vpop.f32.mrf.mxu0  ;;  %v2051_v42 = vpop.f32.mrf.mxu1 }
 0x13b   : > { %1449 = vst.msk [vmem:[%s2672_s8 + $0x1a8] sm:$0xff] %vm1395_vm2, %v1955_v41  ;;  %1513 = vst.msk [vmem:[%s2672_s8 + $0x3a8] sm:$0xff] %vm1395_vm2, %v2051_v42 }
 0x13c   : > { %v1016_v43 = vpop.f32.mrf.mxu0  ;;  %v1336_v44 = vpop.f32.mrf.mxu1 }
 0x13d   : > { %1448 = vst.msk [vmem:[%s2672_s8 + $0x1a0] sm:$0xff] %vm1395_vm2, %v1016_v43  ;;  %1512 = vst.msk [vmem:[%s2672_s8 + $0x3a0] sm:$0xff] %vm1395_vm2, %v1336_v44 }
 0x13e   : > { %v1958_v45 = vpop.f32.mrf.mxu0  ;;  %v2054_v46 = vpop.f32.mrf.mxu1 }
 0x13f   : > { %1451 = vst.msk [vmem:[%s2672_s8 + $0x1b8] sm:$0xff] %vm1395_vm2, %v1958_v45  ;;  %1515 = vst.msk [vmem:[%s2672_s8 + $0x3b8] sm:$0xff] %vm1395_vm2, %v2054_v46 }
 0x140   : > { %v1026_v47 = vpop.f32.mrf.mxu0  ;;  %v1346_v48 = vpop.f32.mrf.mxu1 }
 0x141   : > { %1450 = vst.msk [vmem:[%s2672_s8 + $0x1b0] sm:$0xff] %vm1395_vm2, %v1026_v47  ;;  %1514 = vst.msk [vmem:[%s2672_s8 + $0x3b0] sm:$0xff] %vm1395_vm2, %v1346_v48 }
 0x142   : > { %v1961_v49 = vpop.f32.mrf.mxu0  ;;  %v2057_v50 = vpop.f32.mrf.mxu1 }
 0x143   : > { %1453 = vst.msk [vmem:[%s2672_s8 + $0x1c8] sm:$0xff] %vm1395_vm2, %v1961_v49  ;;  %1517 = vst.msk [vmem:[%s2672_s8 + $0x3c8] sm:$0xff] %vm1395_vm2, %v2057_v50 }
 0x144   : > { %v1036_v51 = vpop.f32.mrf.mxu0  ;;  %v1356_v52 = vpop.f32.mrf.mxu1 }
 0x145   : > { %1452 = vst.msk [vmem:[%s2672_s8 + $0x1c0] sm:$0xff] %vm1395_vm2, %v1036_v51  ;;  %1516 = vst.msk [vmem:[%s2672_s8 + $0x3c0] sm:$0xff] %vm1395_vm2, %v1356_v52 }
 0x146   : > { %v1964_v53 = vpop.f32.mrf.mxu0  ;;  %v2060_v54 = vpop.f32.mrf.mxu1 }
 0x147   : > { %1455 = vst.msk [vmem:[%s2672_s8 + $0x1d8] sm:$0xff] %vm1395_vm2, %v1964_v53  ;;  %1519 = vst.msk [vmem:[%s2672_s8 + $0x3d8] sm:$0xff] %vm1395_vm2, %v2060_v54 }
 0x148   : > { %v1046_v55 = vpop.f32.mrf.mxu0  ;;  %v1366_v56 = vpop.f32.mrf.mxu1 }
 0x149   : > { %1454 = vst.msk [vmem:[%s2672_s8 + $0x1d0] sm:$0xff] %vm1395_vm2, %v1046_v55  ;;  %1518 = vst.msk [vmem:[%s2672_s8 + $0x3d0] sm:$0xff] %vm1395_vm2, %v1366_v56 }
 0x14a   : > { %v1967_v57 = vpop.f32.mrf.mxu0  ;;  %v2063_v58 = vpop.f32.mrf.mxu1 }
 0x14b   : > { %1457 = vst.msk [vmem:[%s2672_s8 + $0x1e8] sm:$0xff] %vm1395_vm2, %v1967_v57  ;;  %1521 = vst.msk [vmem:[%s2672_s8 + $0x3e8] sm:$0xff] %vm1395_vm2, %v2063_v58 }
 0x14c   : > { %v1056_v59 = vpop.f32.mrf.mxu0  ;;  %v1376_v60 = vpop.f32.mrf.mxu1 }
 0x14d   : > { %1456 = vst.msk [vmem:[%s2672_s8 + $0x1e0] sm:$0xff] %vm1395_vm2, %v1056_v59  ;;  %1520 = vst.msk [vmem:[%s2672_s8 + $0x3e0] sm:$0xff] %vm1395_vm2, %v1376_v60 }
 0x14e   : > { %v1970_v61 = vpop.f32.mrf.mxu0  ;;  %v2066_v62 = vpop.f32.mrf.mxu1 }
 0x14f   : > { %1459 = vst.msk [vmem:[%s2672_s8 + $0x1f8] sm:$0xff] %vm1395_vm2, %v1970_v61  ;;  %1523 = vst.msk [vmem:[%s2672_s8 + $0x3f8] sm:$0xff] %vm1395_vm2, %v2066_v62 }
 0x150   : > { %v1066_v63 = vpop.f32.mrf.mxu0  ;;  %v1386_v0 = vpop.f32.mrf.mxu1 }
 0x151   : > { %1458 = vst.msk [vmem:[%s2672_s8 + $0x1f0] sm:$0xff] %vm1395_vm2, %v1066_v63  ;;  %1522 = vst.msk [vmem:[%s2672_s8 + $0x3f0] sm:$0xff] %vm1395_vm2, %v1386_v0 }
 0x152 PF: > { %s12_s11 = sadd.s32 1, %s2115_s11   ;;  %s2942_s9 = smov %s2111_s10 }
 0x153   : > { %p9_p5 = scmp.ge.s32.totalorder %s12_s11, 4   ;;  %s2943_s10 = smov %s2945_s12 }
 0x155   :  { %11 = sbr.rel (!%p9_p5) target bundleno = 2 (0x2), region = 58 }

</bundles_post_ra>
